<compile_context>
chip_gen: v6e
topology: v6e:2x2x1
jax: 0.10.0
libtpu: 0.0.40
codegen_flags: <defaults>
</compile_context>

<pallas_src>
import functools

import jax
import jax.numpy as jnp
from jax.experimental import pallas as pl
from jax.experimental.pallas import tpu as pltpu


def _round_up(n, m):
    return ((n + m - 1) // m) * m


def regvae_kernel(x_ref, eps_ref, hw_ref, hb_ref, dw_ref, db_ref,
                  xy_ref, heads_ref, *, L):
    """One grid step over TILE_B batch rows; all params resident in VMEM.

    x_ref    : (TILE_B, D)       input
    eps_ref  : (TILE_B, L)       reparameterization noise
    hw_ref   : (D, 2L)           [enc_w@mu_w | enc_w@var_w]
    hb_ref   : (1, 2L)           [enc_b@mu_w+mu_b | enc_b@var_w+var_b]
    dw_ref   : (L, D+1)          [dec1_w@dec2_w | dec1_w@dec2_w@top_w]
    db_ref   : (1, D+1)          [dec_b | dec_b@top_w+top_b]
    xy_ref   : (TILE_B, D+1)     output [x_hat | y_hat]
    heads_ref: (TILE_B, 2L)      output [mu | logvar]
    """
    x = x_ref[...]
    eps = eps_ref[...]

    # encode heads: one MXU pass computes mu and logvar together
    heads = jnp.dot(x, hw_ref[...], preferred_element_type=jnp.float32) + hb_ref[...]
    mu = heads[:, :L]
    lvar = heads[:, L:]

    # reparameterize (VPU + EUP): z = mu + eps * exp(0.5 * logvar)
    z = mu + eps * jnp.exp(0.5 * lvar)

    # decode + regression head in one MXU pass: [x_hat | y_hat]
    xy = jnp.dot(z, dw_ref[...], preferred_element_type=jnp.float32) + db_ref[...]

    # two contiguous stores, no lane slicing
    xy_ref[...] = xy
    heads_ref[...] = heads


def init_linear(key, in_dim, out_dim):
    """PyTorch nn.Linear default init: U(-1/sqrt(in), 1/sqrt(in)).
    Weight is returned pre-transposed as (in, out)."""
    kw, kb = jax.random.split(key)
    bound = 1.0 / jnp.sqrt(jnp.float32(in_dim))
    w = jax.random.uniform(kw, (in_dim, out_dim), jnp.float32, -bound, bound)
    b = jax.random.uniform(kb, (1, out_dim), jnp.float32, -bound, bound)
    return w, b


def make_params(key, input_dim, latent_dim, hidden=32):
    keys = jax.random.split(key, 6)
    enc_w, enc_b = init_linear(keys[0], input_dim, hidden)      # encoder: Linear(D, 32)
    mu_w, mu_b = init_linear(keys[1], hidden, latent_dim)       # fc_mu:   Linear(32, L)
    var_w, var_b = init_linear(keys[2], hidden, latent_dim)     # fc_var:  Linear(32, L)
    dec1_w, dec1_b = init_linear(keys[3], latent_dim, hidden)   # decoder[0]: Linear(L, 32)
    dec2_w, dec2_b = init_linear(keys[4], hidden, input_dim)    # decoder[1]: Linear(32, D)
    k5a, k5b = jax.random.split(keys[5])
    top1_w, top1_b = init_linear(k5a, input_dim, hidden)        # top[0]: Linear(D, 32)
    top2_w, top2_b = init_linear(k5b, hidden, 1)                # top[2]: Linear(32, 1)
    return (enc_w, enc_b, mu_w, mu_b, var_w, var_b,
            dec1_w, dec1_b, dec2_w, dec2_b,
            top1_w, top1_b, top2_w, top2_b)


def fold_params(params):
    """Collapse the pure-Linear sub-chains (one-time host-side GEMMs).

    Returns (head_w (D,2L), head_b (1,2L), dec_aug_w (L,D+1), dec_aug_b (1,D+1)).
    The regression head is folded into the decode matmul's last column.
    """
    (enc_w, enc_b, mu_w, mu_b, var_w, var_b,
     dec1_w, dec1_b, dec2_w, dec2_b,
     top1_w, top1_b, top2_w, top2_b) = params

    head_w = jnp.concatenate([enc_w @ mu_w, enc_w @ var_w], axis=1)                  # (D, 2L)
    head_b = jnp.concatenate([enc_b @ mu_w + mu_b, enc_b @ var_w + var_b], axis=1)   # (1, 2L)

    dec_w = dec1_w @ dec2_w                     # (L, D)
    dec_b = dec1_b @ dec2_w + dec2_b            # (1, D)
    top_w = top1_w @ top2_w                     # (D, 1)
    top_b = top1_b @ top2_w + top2_b            # (1, 1)

    dec_aug_w = jnp.concatenate([dec_w, dec_w @ top_w], axis=1)            # (L, D+1)
    dec_aug_b = jnp.concatenate([dec_b, dec_b @ top_w + top_b], axis=1)    # (1, D+1)

    return head_w, head_b, dec_aug_w, dec_aug_b


def regvae_forward(x, eps, folded, *, tile_b=None):
    """Runs the fused RegVAE forward; returns (x_hat, y_hat, mu, logvar)."""
    head_w, head_b, dec_aug_w, dec_aug_b = folded
    B, D = x.shape
    L = eps.shape[1]
    two_l = 2 * L

    if tile_b is None:
        if B >= 512:
            # Large batch: big tiles (multiple of 256 to fill MXU M rows) but
            # keep >=2 grid steps so v7x megacore shards across both TCs.
            tile_b = min(2048, _round_up(-(-B // 2), 256))
        else:
            tile_b = _round_up(B, 8)

    grid = (pl.cdiv(B, tile_b),)
    kernel = functools.partial(regvae_kernel, L=L)

    itemsize = 4
    flops = 2 * B * (D * two_l + L * (D + 1))
    transcendentals = B * L
    bytes_accessed = itemsize * (
        B * (D + L + (D + 1) + two_l)                      # activations in/out
        + D * two_l + two_l + L * (D + 1) + (D + 1))       # folded params

    xy, heads = pl.pallas_call(
        kernel,
        out_shape=(
            jax.ShapeDtypeStruct((B, D + 1), jnp.float32),   # [x_hat | y_hat]
            jax.ShapeDtypeStruct((B, two_l), jnp.float32),   # [mu | logvar]
        ),
        grid=grid,
        in_specs=[
            pl.BlockSpec((tile_b, D), lambda i: (i, 0)),       # x tile
            pl.BlockSpec((tile_b, L), lambda i: (i, 0)),       # eps tile
            pl.BlockSpec((D, two_l), lambda i: (0, 0)),        # head_w (resident)
            pl.BlockSpec((1, two_l), lambda i: (0, 0)),        # head_b (resident)
            pl.BlockSpec((L, D + 1), lambda i: (0, 0)),        # dec_aug_w (resident)
            pl.BlockSpec((1, D + 1), lambda i: (0, 0)),        # dec_aug_b (resident)
        ],
        out_specs=(
            pl.BlockSpec((tile_b, D + 1), lambda i: (i, 0)),
            pl.BlockSpec((tile_b, two_l), lambda i: (i, 0)),
        ),
        compiler_params=pltpu.CompilerParams(
            dimension_semantics=("parallel",),                 # megacore on v7x
        ),
        cost_estimate=pl.CostEstimate(
            flops=flops,
            transcendentals=transcendentals,
            bytes_accessed=bytes_accessed,
        ),
    )(x.astype(jnp.float32), eps.astype(jnp.float32),
      head_w, head_b, dec_aug_w, dec_aug_b)

    x_hat = xy[:, :D]
    y_hat = xy[:, D:]
    mu = heads[:, :L]
    lvar = heads[:, L:]
    return x_hat, y_hat, mu, lvar


if __name__ == "__main__":
    B = 8           # batch
    INPUT_DIM = 16  # input_dim
    LATENT = 5      # latent_dim = k = 5

    key = jax.random.PRNGKey(0)
    kx, keps, kparams = jax.random.split(key, 3)

    x = jax.random.normal(kx, (B, INPUT_DIM), jnp.float32)
    eps = jax.random.normal(keps, (B, LATENT), jnp.float32)
    params = make_params(kparams, INPUT_DIM, LATENT)
    folded = fold_params(params)

    x_hat, y_hat, mu, logvar = regvae_forward(x, eps, folded)
    jax.block_until_ready((x_hat, y_hat, mu, logvar))

    # sanity check against an un-folded plain-JAX reference of the module
    (enc_w, enc_b, mu_w, mu_b, var_w, var_b,
     dec1_w, dec1_b, dec2_w, dec2_b,
     top1_w, top1_b, top2_w, top2_b) = params
    h = x @ enc_w + enc_b
    mu_r = h @ mu_w + mu_b
    lv_r = h @ var_w + var_b
    z_r = mu_r + eps * jnp.exp(0.5 * lv_r)
    xh_r = (z_r @ dec1_w + dec1_b) @ dec2_w + dec2_b
    yh_r = (xh_r @ top1_w + top1_b) @ top2_w + top2_b

    assert jnp.allclose(mu, mu_r, atol=1e-4, rtol=1e-4)
    assert jnp.allclose(logvar, lv_r, atol=1e-4, rtol=1e-4)
    assert jnp.allclose(x_hat, xh_r, atol=1e-4, rtol=1e-4)
    assert jnp.allclose(y_hat, yh_r, atol=1e-4, rtol=1e-4)

    print("KERNEL_OK")
</pallas_src>

<mosaic_0001>
module attributes {stable_mosaic.version = 11 : i64} {
  func.func @regvae_kernel(%arg0: i32, %arg1: memref<8x16xf32, #tpu.memory_space<vmem>>, %arg2: memref<8x5xf32, #tpu.memory_space<vmem>>, %arg3: memref<16x10xf32, #tpu.memory_space<vmem>>, %arg4: memref<1x10xf32, #tpu.memory_space<vmem>>, %arg5: memref<5x17xf32, #tpu.memory_space<vmem>>, %arg6: memref<1x17xf32, #tpu.memory_space<vmem>>, %arg7: memref<8x17xf32, #tpu.memory_space<vmem>>, %arg8: memref<8x10xf32, #tpu.memory_space<vmem>>) attributes {dimension_semantics = [#tpu.dimension_semantics<parallel>], iteration_bounds = array<i64: 1>, scalar_prefetch = 0 : i64, scratch_operands = 0 : i64, tpu.core_type = #tpu.core_type<tc>, window_params = [{transform_indices = @transform_0, window_bounds = array<i64: 8, 16>}, {transform_indices = @transform_1, window_bounds = array<i64: 8, 5>}, {pipeline_mode = #tpu.pipeline_mode<synchronous>, transform_indices = @transform_2, window_bounds = array<i64: 16, 10>}, {pipeline_mode = #tpu.pipeline_mode<synchronous>, transform_indices = @transform_3, window_bounds = array<i64: 1, 10>}, {pipeline_mode = #tpu.pipeline_mode<synchronous>, transform_indices = @transform_4, window_bounds = array<i64: 5, 17>}, {pipeline_mode = #tpu.pipeline_mode<synchronous>, transform_indices = @transform_5, window_bounds = array<i64: 1, 17>}, {transform_indices = @transform_6, window_bounds = array<i64: 8, 17>}, {transform_indices = @transform_7, window_bounds = array<i64: 8, 10>}]} {
    %c0 = arith.constant 0 : index
    %c0_0 = arith.constant 0 : index
    %0 = vector.load %arg1[%c0, %c0_0] : memref<8x16xf32, #tpu.memory_space<vmem>>, vector<8x16xf32>
    %c0_1 = arith.constant 0 : index
    %c0_2 = arith.constant 0 : index
    %1 = vector.load %arg2[%c0_1, %c0_2] : memref<8x5xf32, #tpu.memory_space<vmem>>, vector<8x5xf32>
    %c0_3 = arith.constant 0 : index
    %c0_4 = arith.constant 0 : index
    %2 = vector.load %arg3[%c0_3, %c0_4] : memref<16x10xf32, #tpu.memory_space<vmem>>, vector<16x10xf32>
    %cst = arith.constant dense<0.000000e+00> : vector<8x10xf32>
    %3 = tpu.matmul %0, %2, %cst {dimension_numbers = #tpu.dot_dimension_numbers<[1], [0], [0], [1], [0, 0, 1, 1], [], []>} : vector<8x16xf32>, vector<16x10xf32>, vector<8x10xf32> -> vector<8x10xf32>
    %c0_5 = arith.constant 0 : index
    %c0_6 = arith.constant 0 : index
    %4 = vector.load %arg4[%c0_5, %c0_6] : memref<1x10xf32, #tpu.memory_space<vmem>>, vector<1x10xf32>
    %5 = vector.broadcast %4 : vector<1x10xf32> to vector<8x10xf32>
    %6 = arith.addf %3, %5 : vector<8x10xf32>
    %7 = vector.extract_strided_slice %6 {offsets = [0, 0], sizes = [8, 5], strides = [1, 1]} : vector<8x10xf32> to vector<8x5xf32>
    %8 = vector.extract_strided_slice %6 {offsets = [0, 5], sizes = [8, 5], strides = [1, 1]} : vector<8x10xf32> to vector<8x5xf32>
    %cst_7 = arith.constant 5.000000e-01 : f32
    %9 = vector.broadcast %cst_7 : f32 to vector<8x5xf32>
    %10 = arith.mulf %9, %8 : vector<8x5xf32>
    %11 = math.exp %10 : vector<8x5xf32>
    %12 = arith.mulf %1, %11 : vector<8x5xf32>
    %13 = arith.addf %7, %12 : vector<8x5xf32>
    %c0_8 = arith.constant 0 : index
    %c0_9 = arith.constant 0 : index
    %14 = vector.load %arg5[%c0_8, %c0_9] : memref<5x17xf32, #tpu.memory_space<vmem>>, vector<5x17xf32>
    %cst_10 = arith.constant dense<0.000000e+00> : vector<8x17xf32>
    %15 = tpu.matmul %13, %14, %cst_10 {dimension_numbers = #tpu.dot_dimension_numbers<[1], [0], [0], [1], [0, 0, 1, 1], [], []>} : vector<8x5xf32>, vector<5x17xf32>, vector<8x17xf32> -> vector<8x17xf32>
    %c0_11 = arith.constant 0 : index
    %c0_12 = arith.constant 0 : index
    %16 = vector.load %arg6[%c0_11, %c0_12] : memref<1x17xf32, #tpu.memory_space<vmem>>, vector<1x17xf32>
    %17 = vector.broadcast %16 : vector<1x17xf32> to vector<8x17xf32>
    %18 = arith.addf %15, %17 : vector<8x17xf32>
    %c0_13 = arith.constant 0 : index
    %c0_14 = arith.constant 0 : index
    %19 = vector.load %arg7[%c0_13, %c0_14] : memref<8x17xf32, #tpu.memory_space<vmem>>, vector<8x17xf32>
    tpu.vector_store %arg7[%c0_13, %c0_14], %18 {strides = array<i32>} : memref<8x17xf32, #tpu.memory_space<vmem>>, vector<8x17xf32>,
    %c0_15 = arith.constant 0 : index
    %c0_16 = arith.constant 0 : index
    %20 = vector.load %arg8[%c0_15, %c0_16] : memref<8x10xf32, #tpu.memory_space<vmem>>, vector<8x10xf32>
    tpu.vector_store %arg8[%c0_15, %c0_16], %6 {strides = array<i32>} : memref<8x10xf32, #tpu.memory_space<vmem>>, vector<8x10xf32>,
    return
  }
  func.func @transform_0(%arg0: i32) -> (i32, i32) {
    %c0_i32 = arith.constant 0 : i32
    %c0_i32_0 = arith.constant 0 : i32
    return %arg0, %c0_i32 : i32, i32
  }
  func.func @transform_1(%arg0: i32) -> (i32, i32) {
    %c0_i32 = arith.constant 0 : i32
    %c0_i32_0 = arith.constant 0 : i32
    return %arg0, %c0_i32 : i32, i32
  }
  func.func @transform_2(%arg0: i32) -> (i32, i32) {
    %c0_i32 = arith.constant 0 : i32
    %c0_i32_0 = arith.constant 0 : i32
    %c0_i32_1 = arith.constant 0 : i32
    return %c0_i32, %c0_i32_0 : i32, i32
  }
  func.func @transform_3(%arg0: i32) -> (i32, i32) {
    %c0_i32 = arith.constant 0 : i32
    %c0_i32_0 = arith.constant 0 : i32
    %c0_i32_1 = arith.constant 0 : i32
    return %c0_i32, %c0_i32_0 : i32, i32
  }
  func.func @transform_4(%arg0: i32) -> (i32, i32) {
    %c0_i32 = arith.constant 0 : i32
    %c0_i32_0 = arith.constant 0 : i32
    %c0_i32_1 = arith.constant 0 : i32
    return %c0_i32, %c0_i32_0 : i32, i32
  }
  func.func @transform_5(%arg0: i32) -> (i32, i32) {
    %c0_i32 = arith.constant 0 : i32
    %c0_i32_0 = arith.constant 0 : i32
    %c0_i32_1 = arith.constant 0 : i32
    return %c0_i32, %c0_i32_0 : i32, i32
  }
  func.func @transform_6(%arg0: i32) -> (i32, i32) {
    %c0_i32 = arith.constant 0 : i32
    %c0_i32_0 = arith.constant 0 : i32
    return %arg0, %c0_i32 : i32, i32
  }
  func.func @transform_7(%arg0: i32) -> (i32, i32) {
    %c0_i32 = arith.constant 0 : i32
    %c0_i32_0 = arith.constant 0 : i32
    return %arg0, %c0_i32 : i32, i32
  }
}

</mosaic_0001>

<bundles_post_ra>
// kernel: tpu_custom_call.1
= control target key start
LH: loop header
LB: loop body
LE: loop exit
PB: predicated region body
PF: predicated region fallthrough
CT: control target
= control target key end

     0   :  { %13 = vsyncpa [#allocation3], 0  ;;  %s531_s0 = inlined_call_operand.hbm [shape: f32[8,16], index: 0, kind: input, shape index: {}]   ;;  %s532_s1 = inlined_call_operand.hbm [shape: f32[8,5], index: 1, kind: input, shape index: {}]   ;;  %s533_s2 = inlined_call_operand.hbm [shape: f32[16,10], index: 2, kind: input, shape index: {}]   ;;  %s534_s3 = inlined_call_operand.vmem [shape: f32[1,10], index: 3, kind: input, shape index: {}]   ;;  %s535_s4 = inlined_call_operand.hbm [shape: f32[5,17], index: 4, kind: input, shape index: {}]   ;;  %s536_s5 = inlined_call_operand.vmem [shape: f32[1,17], index: 5, kind: input, shape index: {}]   ;;  %s537_s6 = inlined_call_operand.hbm [shape: f32[8,17], index: 6, kind: output, shape index: {0}]   ;;  %s538_s7 = inlined_call_operand.hbm [shape: f32[8,10], index: 7, kind: output, shape index: {1}]  }
   0x1   :  { %14 = vsyncpa [#allocation6], 0 }
   0x2   :  { %15 = vsyncpa [#allocation9], 0 }
   0x3   :  { %16 = vsyncpa [#allocation4], 0 }
   0x4   :  { %17 = vsyncpa [#allocation12], 0  ;;  %s456_s24 = smov [#allocation5]   ;;  %s457_s26 = smov [#allocation2]  }
   0x5   :  { %s34_s25 = sshll.u32 %s456_s24, 4  ;;  %s24_s27 = sshll.u32 %s457_s26, 4  ;;  %s35_s25 = int_to_ptr.vmem [resolvable:$true] %s34_s25  ;;  %s25_s27 = int_to_ptr.vmem [resolvable:$true] %s24_s27 }
   0x6   :  { %s334_s28 = scalar_lea.vmem %s35_s25, 128  ;;  %p339_p1 = scmp.lt.s32.totalorder %s35_s25, %s35_s25 }
   0x7   :  { %p335_p0 = scmp.ne.s32.totalorder %s35_s25, %s334_s28  ;;  %p340_p2 = scmp.lt.s32.totalorder %s334_s28, %s334_s28 }
   0x9   :  { %p341_p3 = por %p340_p2, %p339_p1 }
   0xb   :  { %p342_p4 = pnand %p341_p3, %p335_p0 }
   0xd   :  { %345 = shalt.err (!%p342_p4)
}
   0xe   :  { %37 = dma.hbm_to_vmem [thread:$0]  %s532_s1, 128, %s35_s25, [#allocation6]  }
   0xf   :  { %s354_s8 = scalar_lea.vmem %s25_s27, 128  ;;  %p359_p6 = scmp.lt.s32.totalorder %s25_s27, %s25_s27 }
  0x10   :  { %p355_p5 = scmp.ne.s32.totalorder %s25_s27, %s354_s8  ;;  %p360_p7 = scmp.lt.s32.totalorder %s354_s8, %s354_s8 }
  0x12   :  { %p361_p8 = por %p360_p7, %p359_p6 }
  0x14   :  { %p362_p9 = pnand %p361_p8, %p355_p5 }
  0x16   :  { %365 = shalt.err (!%p362_p9)
}
  0x17   :  { %27 = dma.hbm_to_vmem [thread:$0]  %s531_s0, 128, %s25_s27, [#allocation3]  }
  0x18   :  { %s458_s11 = smov [#allocation7]  }
  0x19   :  { %s43_s12 = sshll.u32 %s458_s11, 4  ;;  %s44_s12 = int_to_ptr.vmem [resolvable:$true] %s43_s12 }
  0x1a   :  { %s374_s13 = scalar_lea.vmem %s44_s12, 256  ;;  %p379_p11 = scmp.lt.s32.totalorder %s44_s12, %s44_s12 }
  0x1b   :  { %p375_p10 = scmp.ne.s32.totalorder %s44_s12, %s374_s13  ;;  %p380_p12 = scmp.lt.s32.totalorder %s374_s13, %s374_s13 }
  0x1d   :  { %p381_p13 = por %p380_p12, %p379_p11 }
  0x1f   :  { %p382_p0 = pnand %p381_p13, %p375_p10 }
  0x21   :  { %385 = shalt.err (!%p382_p0)
}
  0x22   :  { %s459_s1 = smov 128   ;;  %s460_s14 = smov 8  }
  0x23   :  { %49 = dma.hbm_to_vmem [thread:$0]  %s533_s2, 256, %s44_s12, [#allocation6], %s459_s1, %s459_s1, %s460_s14  }
  0x24   :  { %s461_s17 = smov [#allocation8]  }
  0x25   :  { %s58_s18 = sshll.u32 %s461_s17, 4  ;;  %s59_s18 = int_to_ptr.vmem [resolvable:$true] %s58_s18 }
  0x26   :  { %s394_s0 = scalar_lea.vmem %s59_s18, 128  ;;  %p399_p2 = scmp.lt.s32.totalorder %s59_s18, %s59_s18 }
  0x27   :  { %p395_p1 = scmp.ne.s32.totalorder %s59_s18, %s394_s0  ;;  %p400_p3 = scmp.lt.s32.totalorder %s394_s0, %s394_s0 }
  0x29   :  { %p401_p4 = por %p400_p3, %p399_p2 }
  0x2b   :  { %p402_p5 = pnand %p401_p4, %p395_p1 }
  0x2d   :  { %405 = shalt.err (!%p402_p5)
}
  0x2e   :  { %61 = dma.hbm_to_vmem [thread:$0]  %s535_s4, 128, %s59_s18, [#allocation9]  }
  0x2f   :  { %446 = dma.done.wait [#allocation3], 128  }
  0x30   :  { %447 = vsyncadd [#allocation3], 4294967168 }
  0x31   :  { %448 = dma.done.wait [#allocation6], 384  }
  0x32   :  { %449 = vsyncadd [#allocation6], 4294966912 }
  0x33   :  { %450 = dma.done.wait [#allocation9], 128  }
  0x34   :  { %451 = vsyncadd [#allocation9], 4294967168  ;;  %v462_v0 = vmov 0.0   ;;  %vm463_vm0 = vmmov 0   ;;  %v79_v1 = vld [vmem:[#allocation7 + $0x8] sm:$0xff]  ;;  %v78_v2 = vld [vmem:[#allocation7] sm:$0xff] }
  0x35   :  { %301 = vmatprep.subr.mxu0 %v462_v0  ;;  %305 = vmatprep.mubr.msk.f32.mxu0 %vm463_vm0, %v462_v0  ;;  %v76_v3 = vld [vmem:[#allocation2] sm:$0xff]  ;;  %vm87_vm1 = vcmask 130048   ;;  %vm258_vm2 = vcmask 80896   ;;  %vm182_vm3 = vcmask 1044480   ;;  %s464_s21 = smov 123   ;;  %v77_v12 = vld [vmem:[#allocation5] sm:$0xff] }
  0x36   :  { %308 = vmatprep.subr.mxu1 %v462_v0  ;;  %310 = vmatprep.mubr.msk.f32.mxu1 %vm463_vm0, %v462_v0  ;;  %v291_v4 = vld [vmem:[%s534_s3] ss:$0 sm:$0xff]  ;;  %vm178_vm4 = vcmask 39936   ;;  %s465_s3 = smov [#allocation11]  }
  0x37   :  { %302 = vmatpush3.msra.mxu0 %v79_v1  ;;  %v170_v10 = vld [vmem:[#allocation8] sm:$0x1f]  ;;  %s276_s22 = sshll.u32 %s465_s3, 4  ;;  %s277_s22 = int_to_ptr.vmem [resolvable:$true] %s276_s22 }
  0x38   :  { %303 = vmatprep.subr.mxu0 %v462_v0  ;;  %309 = vmatpush3.msk.msra.mxu1 %vm182_vm3, %v170_v10  ;;  %s406_s23 = scalar_lea.vmem %s277_s22, 128  ;;  %p411_p7 = scmp.lt.s32.totalorder %s277_s22, %s277_s22 }
  0x39   :  { %304 = vmatpush3.msra.mxu0 %v78_v2  ;;  %p407_p6 = scmp.ne.s32.totalorder %s277_s22, %s406_s23  ;;  %p412_p8 = scmp.lt.s32.totalorder %s406_s23, %s406_s23 }
  0x3a   :  { %306 = vmatmul.mubr.msk.f32.vlgmr.msra.gmra.mxu0 %vm87_vm1, %v76_v3 }
  0x3b   :  { %p413_p9 = por %p412_p8, %p411_p7 }
  0x3d   :  { %p414_p10 = pnand %p413_p9, %p407_p6 }
  0xfa   :  { %v157_v5 = vpop.f32.mrf.mxu0 }
  0xfb   :  { %v158_v6 = vadd.f32 %v291_v4, %v157_v5 }
  0xfc   :  { %v307_v7 = vpop.f32.mrf.mxu0 }
  0xfd   :  { %v161_v8 = vmul.f32 0.5, %v158_v6  ;;  %259 = vst.msk [vmem:[#allocation11] sm:$0xff] %vm258_vm2, %v158_v6 }
  0xff   :  { %v162_v9 = vmul.f32 1.442695, %v161_v8 }
 0x101   :  { %324 = vpow2.f32 %v162_v9 }
 0x10e   :  { %v325_v11 = vpop.eup %324 }
 0x10f   :  { %165 = vrot.lane.b32.xlu0 %v325_v11, %s464_s21 }
 0x181   :  { %v166_v13 = vpop.permute.xlu0 %165 }
 0x182   :  { %v168_v14 = vmul.f32 %v166_v13, %v77_v12 }
 0x184   :  { %v169_v15 = vadd.f32 %v168_v14, %v158_v6 }
 0x186   :  { %311 = vmatmul.mubr.msk.f32.vlgmr.msra.gmra.mxu1 %vm178_vm4, %v169_v15 }
 0x187   :  { %417 = shalt.err (!%p414_p10)
}
 0x188   :  { %279 = dma.vmem_to_hbm [thread:$0]  %s277_s22, 128, %s538_s7, [#allocation12]   ;;  %v293_v16 = vld [vmem:[%s536_s5] ss:$0 sm:$0xff]  ;;  %vm256_vm5 = vcmask 138240  }
 0x189   :  { %s466_s28 = smov [#allocation10]  }
 0x18a   :  { %s266_s29 = sshll.u32 %s466_s28, 4  ;;  %s267_s29 = int_to_ptr.vmem [resolvable:$true] %s266_s29 }
 0x18b   :  { %s426_s30 = scalar_lea.vmem %s267_s29, 128  ;;  %p431_p12 = scmp.lt.s32.totalorder %s267_s29, %s267_s29 }
 0x18c   :  { %p427_p11 = scmp.ne.s32.totalorder %s267_s29, %s426_s30  ;;  %p432_p13 = scmp.lt.s32.totalorder %s426_s30, %s426_s30 }
 0x18e   :  { %p433_p0 = por %p432_p13, %p431_p12 }
 0x190   :  { %p434_p1 = pnand %p433_p0, %p427_p11 }
 0x246   :  { %v252_v17 = vpop.f32.mrf.mxu1 }
 0x247   :  { %v253_v18 = vadd.f32 %v293_v16, %v252_v17 }
 0x248   :  { %v312_v19 = vpop.f32.mrf.mxu1 }
 0x249   :  { %257 = vst.msk [vmem:[#allocation10] sm:$0xff] %vm256_vm5, %v253_v18 }
 0x24a   :  { %437 = shalt.err (!%p434_p1)
}
 0x24b   :  { %269 = dma.vmem_to_hbm [thread:$0]  %s267_s29, 128, %s537_s6, [#allocation4]  }
 0x24c   :  { %452 = dma.done.wait [#allocation4], 128  }
 0x24d   :  { %453 = vsyncadd [#allocation4], 4294967168 }
 0x24e   :  { %454 = dma.done.wait [#allocation12], 128  }
 0x24f   :  { %455 = vsyncadd [#allocation12], 4294967168 }
 0x250   :  { %286 = vsyncpa [#allocation3], 1 }
 0x251   :  { %287 = vsyncpa [#allocation6], 1 }
 0x252   :  { %288 = vsyncpa [#allocation9], 1 }
 0x253   :  { %289 = vsyncpa [#allocation4], 1 }
 0x254   :  { %290 = vsyncpa [#allocation12], 1 }

</bundles_post_ra>
